<compile_context>
chip_gen: v6e
topology: v6e:2x2x1
jax: 0.10.0
libtpu: 0.0.40
codegen_flags: <defaults>
</compile_context>

<pallas_src>
import jax
import jax.numpy as jnp
from jax.experimental import pallas as pl
from jax.experimental.pallas import tpu as pltpu


def _concat_last_kernel(x1_ref, x2_ref, o_ref):
    # x1_ref: (tm, C1), x2_ref: (tm, C2), o_ref: (tm, C1 + C2)
    c1 = x1_ref.shape[1]
    c2 = x2_ref.shape[1]
    # Two static-slice, lane-dense stores; no reshapes, no XLU work.
    o_ref[:, 0:c1] = x1_ref[...].astype(o_ref.dtype)
    o_ref[:, c1:c1 + c2] = x2_ref[...].astype(o_ref.dtype)


def _round_up(x, m):
    return ((x + m - 1) // m) * m


def _round_down(x, m):
    return (x // m) * m


def _tpu_vmem_capacity_bytes():
    try:
        return int(pltpu.get_tpu_info().vmem_capacity_bytes)
    except Exception:
        return 128 * 1024 * 1024  # v5e/v6e default


def _num_tensorcores_per_chip():
    # v7x has 2 TensorCores per chip; v5e/v6e have 1.
    try:
        kind = jax.devices()[0].device_kind.lower()
        if "v7" in kind:
            return 2
    except Exception:
        pass
    return 1


def _pick_tm(rows, c_out, itemsize, budget_bytes, num_tc):
    """Largest row tile whose double-buffered footprint fits the VMEM budget."""
    # Sublane packing: f32 -> 8 rows, bf16 -> 16, int8/fp8 -> 32.
    sub = {4: 8, 2: 16, 1: 32}.get(itemsize, 8)
    # Per row: inputs (c1 + c2 = c_out) + output (c_out), double-buffered.
    per_row = 2 * (2 * c_out) * itemsize
    cap_rows = budget_bytes // max(per_row, 1)
    if cap_rows < min(sub, rows):
        # Even the smallest legal tile overflows the VMEM budget.
        # TODO(synk): add a channel-axis grid dimension for extremely wide c_out.
        return None
    if rows <= sub:
        return rows  # full-extent block along rows is always legal
    tm = min(_round_down(cap_rows, sub), _round_up(rows, sub))
    tm = max(tm, sub)
    # v7x only: make sure the "parallel" axis has >= 2 steps so both
    # TensorCores stream from HBM.  Pure overhead on single-TC chips.
    if num_tc >= 2 and tm >= rows and rows > sub:
        tm = max(sub, _round_up(pl.cdiv(rows, 2), sub))
    return tm


def concat_last_dim(x1, x2, *, small_input_bytes=1 << 20):
    """Pallas equivalent of torch.cat((x1, x2), dim=-1)."""
    assert x1.shape[:-1] == x2.shape[:-1], "leading dims must match for concat"
    lead = x1.shape[:-1]
    c1 = x1.shape[-1]
    c2 = x2.shape[-1]
    c_out = c1 + c2
    out_dtype = jnp.result_type(x1.dtype, x2.dtype)

    rows = 1
    for d in lead:
        rows *= d

    itemsize = jnp.dtype(out_dtype).itemsize
    total_bytes = 2 * rows * c_out * itemsize  # read + write traffic

    # Fast path / fallbacks: tiny inputs (XLA fuses them into the consumer),
    # degenerate shapes, or a lane-misaligned split point (c1 % 128 != 0 turns
    # the second store into masked vst + cross-lane shuffles).
    if (rows == 0 or c1 == 0 or c2 == 0
            or total_bytes < small_input_bytes
            or c1 % 128 != 0):
        return jnp.concatenate([x1, x2], axis=-1).astype(out_dtype)

    vmem_capacity = _tpu_vmem_capacity_bytes()
    num_tc = _num_tensorcores_per_chip()
    # Keep the double-buffered working set to ~half of physical VMEM,
    # capped at 64 MiB (=> ~32 MiB on v7x's 64 MiB VMEM).
    budget = min(vmem_capacity // 2, 64 * 1024 * 1024)

    tm = _pick_tm(rows, c_out, itemsize, budget, num_tc)
    if tm is None:
        # Extremely wide channel count: fall back rather than VMEM-OOM.
        return jnp.concatenate([x1, x2], axis=-1).astype(out_dtype)

    vmem_limit = int(min(budget + (16 << 20), vmem_capacity))

    x1f = x1.reshape(rows, c1)
    x2f = x2.reshape(rows, c2)

    out_flat = pl.pallas_call(
        _concat_last_kernel,
        out_shape=jax.ShapeDtypeStruct((rows, c_out), out_dtype),
        grid_spec=pltpu.PrefetchScalarGridSpec(
            num_scalar_prefetch=0,
            grid=(pl.cdiv(rows, tm),),
            in_specs=[
                pl.BlockSpec((tm, c1), lambda i: (i, 0)),
                pl.BlockSpec((tm, c2), lambda i: (i, 0)),
            ],
            out_specs=pl.BlockSpec((tm, c_out), lambda i: (i, 0)),
        ),
        compiler_params=pltpu.CompilerParams(
            dimension_semantics=("parallel",),
            vmem_limit_bytes=vmem_limit,
        ),
        cost_estimate=pl.CostEstimate(
            flops=0,
            transcendentals=0,
            bytes_accessed=total_bytes,
        ),
    )(x1f, x2f)

    return out_flat.reshape(*lead, c_out)


if __name__ == "__main__":
    key = jax.random.PRNGKey(0)
    k1, k2 = jax.random.split(key, 2)

    # Small SwinMFF-style token features: (B, L, C) with channels last.
    B, L, C = 2, 64, 128
    x1 = jax.random.normal(k1, (B, L, C), dtype=jnp.float32)
    x2 = jax.random.normal(k2, (B, L, C), dtype=jnp.float32)
    ref = jnp.concatenate([x1, x2], axis=-1)

    # Force the Pallas path (the default small-input fast path would route this
    # tiny demo shape through XLA concat).
    out = concat_last_dim(x1, x2, small_input_bytes=0)
    out = jax.block_until_ready(out)
    assert out.shape == (B, L, 2 * C), out.shape
    assert out.dtype == ref.dtype, (out.dtype, ref.dtype)
    assert jnp.array_equal(out, ref), float(jnp.max(jnp.abs(out - ref)))

    # Default-argument path (small-input fast path) must also be correct.
    out2 = jax.block_until_ready(concat_last_dim(x1, x2))
    assert jnp.array_equal(out2, ref)

    print("KERNEL_OK")
</pallas_src>

<mosaic_0001>
module attributes {stable_mosaic.version = 11 : i64} {
  func.func @_concat_last_kernel(%arg0: i32, %arg1: memref<128x128xf32, #tpu.memory_space<vmem>>, %arg2: memref<128x128xf32, #tpu.memory_space<vmem>>, %arg3: memref<128x256xf32, #tpu.memory_space<vmem>>) attributes {dimension_semantics = [#tpu.dimension_semantics<parallel>], iteration_bounds = array<i64: 1>, scalar_prefetch = 0 : i64, scratch_operands = 0 : i64, tpu.core_type = #tpu.core_type<tc>, window_params = [{transform_indices = @transform_0, window_bounds = array<i64: 128, 128>}, {transform_indices = @transform_1, window_bounds = array<i64: 128, 128>}, {transform_indices = @transform_2, window_bounds = array<i64: 128, 256>}]} {
    %c0 = arith.constant 0 : index
    %c0_0 = arith.constant 0 : index
    %0 = vector.load %arg1[%c0, %c0_0] : memref<128x128xf32, #tpu.memory_space<vmem>>, vector<128x128xf32>
    %c0_1 = arith.constant 0 : index
    %c0_2 = arith.constant 0 : index
    %1 = vector.load %arg3[%c0_1, %c0_2] : memref<128x256xf32, #tpu.memory_space<vmem>>, vector<128x128xf32>
    tpu.vector_store %arg3[%c0_1, %c0_2], %0 {strides = array<i32>} : memref<128x256xf32, #tpu.memory_space<vmem>>, vector<128x128xf32>,
    %c0_3 = arith.constant 0 : index
    %c0_4 = arith.constant 0 : index
    %2 = vector.load %arg2[%c0_3, %c0_4] : memref<128x128xf32, #tpu.memory_space<vmem>>, vector<128x128xf32>
    %c0_5 = arith.constant 0 : index
    %c128 = arith.constant 128 : index
    %3 = vector.load %arg3[%c0_5, %c128] : memref<128x256xf32, #tpu.memory_space<vmem>>, vector<128x128xf32>
    tpu.vector_store %arg3[%c0_5, %c128], %2 {strides = array<i32>} : memref<128x256xf32, #tpu.memory_space<vmem>>, vector<128x128xf32>,
    return
  }
  func.func @transform_0(%arg0: i32) -> (i32, i32) {
    %c0_i32 = arith.constant 0 : i32
    %c0_i32_0 = arith.constant 0 : i32
    return %arg0, %c0_i32 : i32, i32
  }
  func.func @transform_1(%arg0: i32) -> (i32, i32) {
    %c0_i32 = arith.constant 0 : i32
    %c0_i32_0 = arith.constant 0 : i32
    return %arg0, %c0_i32 : i32, i32
  }
  func.func @transform_2(%arg0: i32) -> (i32, i32) {
    %c0_i32 = arith.constant 0 : i32
    %c0_i32_0 = arith.constant 0 : i32
    return %arg0, %c0_i32 : i32, i32
  }
}

</mosaic_0001>

<bundles_post_ra>
// kernel: tpu_custom_call.1
= control target key start
LH: loop header
LB: loop body
LE: loop exit
PB: predicated region body
PF: predicated region fallthrough
CT: control target
= control target key end

     0   :  { %7 = vsyncpa [#allocation3], 0  ;;  %s226_s0 = inlined_call_operand.hbm [shape: f32[128,128], index: 0, kind: input, shape index: {}]   ;;  %s227_s1 = inlined_call_operand.hbm [shape: f32[128,128], index: 1, kind: input, shape index: {}]   ;;  %s228_s2 = inlined_call_operand.hbm [shape: f32[128,256], index: 2, kind: output, shape index: {}]  }
   0x1   :  { %8 = vsyncpa [#allocation6], 0 }
   0x2   :  { %9 = vsyncpa [#allocation4], 0  ;;  %s195_s9 = smov [#allocation2]  }
   0x3   :  { %s15_s10 = sshll.u32 %s195_s9, 4  ;;  %s16_s10 = int_to_ptr.vmem [resolvable:$true] %s15_s10 }
   0x4   :  { %s137_s11 = scalar_lea.vmem %s16_s10, 2048  ;;  %p142_p1 = scmp.lt.s32.totalorder %s16_s10, %s16_s10 }
   0x5   :  { %p138_p0 = scmp.ne.s32.totalorder %s16_s10, %s137_s11  ;;  %p143_p2 = scmp.lt.s32.totalorder %s137_s11, %s137_s11 }
   0x7   :  { %p144_p3 = por %p143_p2, %p142_p1 }
   0x9   :  { %p145_p4 = pnand %p144_p3, %p138_p0 }
   0xb   :  { %148 = shalt.err (!%p145_p4)
}
   0xc   :  { %s196_s12 = smov 128   ;;  %s197_s13 = smov 8  }
   0xd   :  { %21 = dma.hbm_to_vmem [thread:$0]  %s226_s0, 2048, %s16_s10, [#allocation3], %s196_s12, %s196_s12, %s197_s13  }
   0xe   :  { %s198_s16 = smov [#allocation5]  }
   0xf   :  { %s27_s17 = sshll.u32 %s198_s16, 4  ;;  %s28_s17 = int_to_ptr.vmem [resolvable:$true] %s27_s17 }
  0x10   :  { %s157_s18 = scalar_lea.vmem %s28_s17, 2048  ;;  %p162_p6 = scmp.lt.s32.totalorder %s28_s17, %s28_s17 }
  0x11   :  { %p158_p5 = scmp.ne.s32.totalorder %s28_s17, %s157_s18  ;;  %p163_p7 = scmp.lt.s32.totalorder %s157_s18, %s157_s18 }
  0x13   :  { %p164_p8 = por %p163_p7, %p162_p6 }
  0x15   :  { %p165_p9 = pnand %p164_p8, %p158_p5 }
  0x17   :  { %168 = shalt.err (!%p165_p9)
}
  0x18   :  { %33 = dma.hbm_to_vmem [thread:$0]  %s227_s1, 2048, %s28_s17, [#allocation6], %s196_s12, %s196_s12, %s197_s13  }
  0x19   :  { %189 = dma.done.wait [#allocation3], 2048  }
  0x1a   :  { %190 = vsyncadd [#allocation3], 4294965248 }
  0x1b   :  { %191 = dma.done.wait [#allocation6], 2048  }
  0x1c   :  { %192 = vsyncadd [#allocation6], 4294965248  ;;  %v40_v0 = vld [vmem:[#allocation2] sm:$0xff]  ;;  %v41_v1 = vld [vmem:[#allocation2 + $0x8] sm:$0xff]  ;;  %s199_s0 = smov [#allocation7]  }
  0x1d   :  { %v42_v2 = vld [vmem:[#allocation2 + $0x10] sm:$0xff]  ;;  %56 = vst [vmem:[#allocation7] sm:$0xff] %v40_v0  ;;  %57 = vst [vmem:[#allocation7 + $0x10] sm:$0xff] %v41_v1  ;;  %v43_v3 = vld [vmem:[#allocation2 + $0x18] sm:$0xff]  ;;  %s109_s1 = sshll.u32 %s199_s0, 4  ;;  %s110_s1 = int_to_ptr.vmem [resolvable:$true] %s109_s1 }
  0x1e   :  { %58 = vst [vmem:[#allocation7 + $0x20] sm:$0xff] %v42_v2  ;;  %v44_v4 = vld [vmem:[#allocation2 + $0x20] sm:$0xff]  ;;  %v45_v5 = vld [vmem:[#allocation2 + $0x28] sm:$0xff]  ;;  %59 = vst [vmem:[#allocation7 + $0x30] sm:$0xff] %v43_v3  ;;  %s169_s21 = scalar_lea.vmem %s110_s1, 4096  ;;  %p174_p11 = scmp.lt.s32.totalorder %s110_s1, %s110_s1 }
  0x1f   :  { %60 = vst [vmem:[#allocation7 + $0x40] sm:$0xff] %v44_v4  ;;  %61 = vst [vmem:[#allocation7 + $0x50] sm:$0xff] %v45_v5  ;;  %v46_v6 = vld [vmem:[#allocation2 + $0x30] sm:$0xff]  ;;  %v47_v7 = vld [vmem:[#allocation2 + $0x38] sm:$0xff]  ;;  %p170_p10 = scmp.ne.s32.totalorder %s110_s1, %s169_s21  ;;  %p175_p12 = scmp.lt.s32.totalorder %s169_s21, %s169_s21 }
  0x20   :  { %v48_v8 = vld [vmem:[#allocation2 + $0x40] sm:$0xff]  ;;  %62 = vst [vmem:[#allocation7 + $0x60] sm:$0xff] %v46_v6  ;;  %63 = vst [vmem:[#allocation7 + $0x70] sm:$0xff] %v47_v7  ;;  %v49_v9 = vld [vmem:[#allocation2 + $0x48] sm:$0xff] }
  0x21   :  { %64 = vst [vmem:[#allocation7 + $0x80] sm:$0xff] %v48_v8  ;;  %v50_v10 = vld [vmem:[#allocation2 + $0x50] sm:$0xff]  ;;  %v51_v11 = vld [vmem:[#allocation2 + $0x58] sm:$0xff]  ;;  %65 = vst [vmem:[#allocation7 + $0x90] sm:$0xff] %v49_v9  ;;  %p176_p13 = por %p175_p12, %p174_p11 }
  0x22   :  { %66 = vst [vmem:[#allocation7 + $0xa0] sm:$0xff] %v50_v10  ;;  %67 = vst [vmem:[#allocation7 + $0xb0] sm:$0xff] %v51_v11  ;;  %v52_v12 = vld [vmem:[#allocation2 + $0x60] sm:$0xff]  ;;  %v53_v13 = vld [vmem:[#allocation2 + $0x68] sm:$0xff] }
  0x23   :  { %v54_v14 = vld [vmem:[#allocation2 + $0x70] sm:$0xff]  ;;  %68 = vst [vmem:[#allocation7 + $0xc0] sm:$0xff] %v52_v12  ;;  %69 = vst [vmem:[#allocation7 + $0xd0] sm:$0xff] %v53_v13  ;;  %v55_v15 = vld [vmem:[#allocation2 + $0x78] sm:$0xff]  ;;  %p177_p0 = pnand %p176_p13, %p170_p10 }
  0x24   :  { %70 = vst [vmem:[#allocation7 + $0xe0] sm:$0xff] %v54_v14  ;;  %v72_v16 = vld [vmem:[#allocation5] sm:$0xff]  ;;  %v73_v17 = vld [vmem:[#allocation5 + $0x8] sm:$0xff]  ;;  %71 = vst [vmem:[#allocation7 + $0xf0] sm:$0xff] %v55_v15 }
  0x25   :  { %88 = vst [vmem:[#allocation7 + $0x8] sm:$0xff] %v72_v16  ;;  %89 = vst [vmem:[#allocation7 + $0x18] sm:$0xff] %v73_v17  ;;  %v74_v18 = vld [vmem:[#allocation5 + $0x10] sm:$0xff]  ;;  %v75_v19 = vld [vmem:[#allocation5 + $0x18] sm:$0xff] }
  0x26   :  { %v76_v20 = vld [vmem:[#allocation5 + $0x20] sm:$0xff]  ;;  %90 = vst [vmem:[#allocation7 + $0x28] sm:$0xff] %v74_v18  ;;  %91 = vst [vmem:[#allocation7 + $0x38] sm:$0xff] %v75_v19  ;;  %v77_v21 = vld [vmem:[#allocation5 + $0x28] sm:$0xff] }
  0x27   :  { %92 = vst [vmem:[#allocation7 + $0x48] sm:$0xff] %v76_v20  ;;  %v78_v22 = vld [vmem:[#allocation5 + $0x30] sm:$0xff]  ;;  %v79_v23 = vld [vmem:[#allocation5 + $0x38] sm:$0xff]  ;;  %93 = vst [vmem:[#allocation7 + $0x58] sm:$0xff] %v77_v21 }
  0x28   :  { %94 = vst [vmem:[#allocation7 + $0x68] sm:$0xff] %v78_v22  ;;  %95 = vst [vmem:[#allocation7 + $0x78] sm:$0xff] %v79_v23  ;;  %v80_v24 = vld [vmem:[#allocation5 + $0x40] sm:$0xff]  ;;  %v81_v25 = vld [vmem:[#allocation5 + $0x48] sm:$0xff] }
  0x29   :  { %v82_v26 = vld [vmem:[#allocation5 + $0x50] sm:$0xff]  ;;  %96 = vst [vmem:[#allocation7 + $0x88] sm:$0xff] %v80_v24  ;;  %97 = vst [vmem:[#allocation7 + $0x98] sm:$0xff] %v81_v25  ;;  %v83_v27 = vld [vmem:[#allocation5 + $0x58] sm:$0xff] }
  0x2a   :  { %98 = vst [vmem:[#allocation7 + $0xa8] sm:$0xff] %v82_v26  ;;  %v84_v28 = vld [vmem:[#allocation5 + $0x60] sm:$0xff]  ;;  %v85_v29 = vld [vmem:[#allocation5 + $0x68] sm:$0xff]  ;;  %99 = vst [vmem:[#allocation7 + $0xb8] sm:$0xff] %v83_v27 }
  0x2b   :  { %100 = vst [vmem:[#allocation7 + $0xc8] sm:$0xff] %v84_v28  ;;  %101 = vst [vmem:[#allocation7 + $0xd8] sm:$0xff] %v85_v29  ;;  %v86_v30 = vld [vmem:[#allocation5 + $0x70] sm:$0xff]  ;;  %v87_v31 = vld [vmem:[#allocation5 + $0x78] sm:$0xff] }
  0x2c   :  { %102 = vst [vmem:[#allocation7 + $0xe8] sm:$0xff] %v86_v30  ;;  %103 = vst [vmem:[#allocation7 + $0xf8] sm:$0xff] %v87_v31 }
  0x2d   :  { %180 = shalt.err (!%p177_p0)
}
  0x2e   :  { %s200_s22 = smov 256   ;;  %s201_s23 = smov 16  }
  0x2f   :  { %115 = dma.vmem_to_hbm [thread:$0]  %s110_s1, 4096, %s228_s2, [#allocation4], %s200_s22, %s200_s22, %s201_s23  }
  0x30   :  { %193 = dma.done.wait [#allocation4], 4096  }
  0x31   :  { %194 = vsyncadd [#allocation4], 4294963200 }
  0x32   :  { %119 = vsyncpa [#allocation3], 1 }
  0x33   :  { %120 = vsyncpa [#allocation6], 1 }
  0x34   :  { %121 = vsyncpa [#allocation4], 1 }

</bundles_post_ra>
